<compile_context>
chip_gen: v6e
topology: v6e:2x2x1
jax: 0.10.0
libtpu: 0.0.40
codegen_flags: <defaults>
</compile_context>

<pallas_src>
import jax
import jax.numpy as jnp
from jax import lax
from jax.experimental import pallas as pl
from jax.experimental.pallas import tpu as pltpu


# ---------------------------------------------------------------------------
# Pallas kernel: per-pixel softmax cross-entropy
# ---------------------------------------------------------------------------
def _ce_kernel(logits_ref, target_ref, loss_ref):
    # logits_ref: (C, tile) bf16 — classes on sublanes, pixels on lanes.
    # target_ref: (1, tile) int32.
    # loss_ref:   (1, tile) f32  — lane-dense store.
    x = logits_ref[...].astype(jnp.float32)                       # (C, tile)
    t = target_ref[...]                                           # (1, tile)

    m = jnp.max(x, axis=0, keepdims=True)                         # (1, tile)
    lse = jnp.log(jnp.sum(jnp.exp(x - m), axis=0, keepdims=True)) + m

    ids = lax.broadcasted_iota(jnp.int32, x.shape, 0)              # class ids
    tgt_logit = jnp.sum(jnp.where(ids == t, x, 0.0), axis=0, keepdims=True)

    loss_ref[...] = lse - tgt_logit                                # -log p(target)


# ---------------------------------------------------------------------------
# Tiling helpers
# ---------------------------------------------------------------------------
def _round_up(x, m):
    return (x + m - 1) // m * m


def _pick_tile(hw, c, bytes_per_elem=2, vmem_budget=8 << 20, max_tile=2048):
    """Pick the pixel-tile width (multiple of 128).

    Budget covers the double-buffered logits + target + loss blocks and is
    kept well under the scoped-VMEM default on every generation (v5e 16 MiB,
    v6e/v7x 32 MiB scoped).  Prefers a tile that divides hw exactly so the
    wrapper never has to materialize a padded copy of the logits.
    """
    per_pixel = c * bytes_per_elem + 4 + 4          # logits + target + loss
    cap = max_tile
    while cap > 128 and 2 * per_pixel * cap > vmem_budget:
        cap //= 2
    cap = min(cap, _round_up(hw, 128))

    min_ok = min(cap, 512)                          # a >=512 tile is ~roofline
    t = cap
    while t >= min_ok:
        if hw % t == 0:
            return t
        t -= 128
    return cap                                      # fallback: pad hw up to cap


def _per_pixel_ce(logits, target, tile):
    # logits: (N, C, HWp) bf16, target: (N, 1, HWp) int32 -> (N, 1, HWp) f32.
    N, C, HWp = logits.shape
    assert HWp % tile == 0
    return pl.pallas_call(
        _ce_kernel,
        out_shape=jax.ShapeDtypeStruct((N, 1, HWp), jnp.float32),
        grid_spec=pltpu.PrefetchScalarGridSpec(
            num_scalar_prefetch=0,
            grid=(N, HWp // tile),
            in_specs=[
                pl.BlockSpec((None, C, tile), lambda n, i: (n, 0, i)),
                pl.BlockSpec((None, 1, tile), lambda n, i: (n, 0, i)),
            ],
            out_specs=pl.BlockSpec((None, 1, tile), lambda n, i: (n, 0, i)),
        ),
        compiler_params=pltpu.CompilerParams(
            dimension_semantics=("parallel", "parallel"),
            vmem_limit_bytes=32 << 20,
        ),
    )(logits, target)


# ---------------------------------------------------------------------------
# OHEM cross-entropy forward
# ---------------------------------------------------------------------------
def ohem_cross_entropy_loss(output_nchw, target_nhw, threshold, keep_num, tile=None):
    """Forward pass of OHEM_CrossEntroy_Loss.

    output_nchw: (N, C, H, W) float logits
    target_nhw:  (N, H, W) integer class indices
    """
    N, C, H, W = output_nchw.shape
    HW = H * W
    M = N * HW
    if keep_num + 1 > M:
        raise ValueError(
            f"keep_num ({keep_num}) must be < number of pixels ({M}), "
            "as in the PyTorch reference (loss[keep_num])."
        )

    # bf16 DMA of the dominant logits traffic; compute stays f32 in-kernel.
    logits = output_nchw.astype(jnp.bfloat16).reshape(N, C, HW)
    target = target_nhw.reshape(N, 1, HW).astype(jnp.int32)

    if tile is None:
        tile = _pick_tile(HW, C, bytes_per_elem=2)
    HWp = _round_up(HW, tile)
    if HWp != HW:
        # Fallback path only (the tile picker prefers exact divisors of HW);
        # padded pixels are per-lane independent and sliced off below.
        logits = jnp.pad(logits, ((0, 0), (0, 0), (0, HWp - HW)))
        target = jnp.pad(target, ((0, 0), (0, 0), (0, HWp - HW)))

    per_loss = _per_pixel_ce(logits, target, tile)[:, 0, :HW].reshape(-1)  # (M,)

    # OHEM selection: reference's torch.sort(descending)+indexing / boolean
    # masking reproduced with lax.top_k(keep_num+1) + masked static-shape
    # reductions (mathematically identical means).
    topk = lax.top_k(per_loss, keep_num + 1)[0]                  # descending
    threshold_in_keep_num = topk[keep_num]

    above = per_loss > threshold
    n_above = jnp.maximum(jnp.sum(above).astype(jnp.float32), 1.0)  # 0/0 guard
    mean_above = jnp.sum(jnp.where(above, per_loss, 0.0)) / n_above
    mean_topk = jnp.mean(topk[:keep_num])

    # TODO(synk): no ignore_index handling (PyTorch CrossEntropyLoss default
    # -100); labels are assumed to lie in [0, C) like the reference usage.
    return jnp.where(threshold_in_keep_num > threshold, mean_above, mean_topk)


if __name__ == "__main__":
    key = jax.random.PRNGKey(0)
    k1, k2 = jax.random.split(key)

    N, C, H, W = 2, 4, 16, 16
    threshold = 0.3
    keep_num = 100            # must be < N*H*W (=512), mirroring loss[keep_num]

    output = jax.random.normal(k1, (N, C, H, W), dtype=jnp.float32)
    target = jax.random.randint(k2, (N, H, W), 0, C, dtype=jnp.int32)

    result = ohem_cross_entropy_loss(output, target, threshold, keep_num)
    jax.block_until_ready(result)

    # sanity: finite scalar
    assert result.shape == ()
    assert bool(jnp.isfinite(result))

    print("KERNEL_OK")
</pallas_src>

<mosaic_0001>
module attributes {stable_mosaic.version = 11 : i64} {
  func.func @_ce_kernel(%arg0: i32, %arg1: i32, %arg2: memref<1x4x256xbf16, #tpu.memory_space<vmem>>, %arg3: memref<1x1x256xi32, #tpu.memory_space<vmem>>, %arg4: memref<1x1x256xf32, #tpu.memory_space<vmem>>) attributes {dimension_semantics = [#tpu.dimension_semantics<parallel>, #tpu.dimension_semantics<parallel>], iteration_bounds = array<i64: 2, 1>, scalar_prefetch = 0 : i64, scratch_operands = 0 : i64, tpu.core_type = #tpu.core_type<tc>, window_params = [{transform_indices = @transform_0, window_bounds = array<i64: 1, 4, 256>}, {transform_indices = @transform_1, window_bounds = array<i64: 1, 1, 256>}, {transform_indices = @transform_2, window_bounds = array<i64: 1, 1, 256>}]} {
    %c0 = arith.constant 0 : index
    %c0_0 = arith.constant 0 : index
    %c0_1 = arith.constant 0 : index
    %0 = vector.load %arg2[%c0, %c0_0, %c0_1] : memref<1x4x256xbf16, #tpu.memory_space<vmem>>, vector<1x4x256xbf16>
    %1 = vector.shape_cast %0 : vector<1x4x256xbf16> to vector<4x256xbf16>
    %2 = arith.extf %1 : vector<4x256xbf16> to vector<4x256xf32>
    %c0_2 = arith.constant 0 : index
    %c0_3 = arith.constant 0 : index
    %c0_4 = arith.constant 0 : index
    %3 = vector.load %arg3[%c0_2, %c0_3, %c0_4] : memref<1x1x256xi32, #tpu.memory_space<vmem>>, vector<1x1x256xi32>
    %4 = vector.shape_cast %3 : vector<1x1x256xi32> to vector<1x256xi32>
    %cst = arith.constant dense<0xFF800000> : vector<256xf32>
    %5 = vector.multi_reduction <maximumf>, %2, %cst [0] : vector<4x256xf32> to vector<256xf32>
    %6 = vector.shape_cast %5 : vector<256xf32> to vector<1x256xf32>
    %7 = vector.broadcast %6 : vector<1x256xf32> to vector<4x256xf32>
    %8 = arith.subf %2, %7 : vector<4x256xf32>
    %9 = math.exp %8 : vector<4x256xf32>
    %cst_5 = arith.constant dense<0.000000e+00> : vector<256xf32>
    %10 = vector.multi_reduction <add>, %9, %cst_5 [0] : vector<4x256xf32> to vector<256xf32>
    %11 = vector.shape_cast %10 : vector<256xf32> to vector<1x256xf32>
    %12 = math.log %11 : vector<1x256xf32>
    %13 = arith.addf %12, %6 : vector<1x256xf32>
    %14 = tpu.iota {dimensions = array<i32: 0>} : vector<4x256xi32>
    %15 = vector.broadcast %4 : vector<1x256xi32> to vector<4x256xi32>
    %16 = arith.cmpi eq, %14, %15 : vector<4x256xi32>
    %cst_6 = arith.constant 0.000000e+00 : f32
    %17 = vector.broadcast %cst_6 : f32 to vector<4x256xf32>
    %18 = arith.select %16, %2, %17 : vector<4x256xi1>, vector<4x256xf32>
    %cst_7 = arith.constant dense<0.000000e+00> : vector<256xf32>
    %19 = vector.multi_reduction <add>, %18, %cst_7 [0] : vector<4x256xf32> to vector<256xf32>
    %20 = vector.shape_cast %19 : vector<256xf32> to vector<1x256xf32>
    %21 = arith.subf %13, %20 : vector<1x256xf32>
    %c0_8 = arith.constant 0 : index
    %c0_9 = arith.constant 0 : index
    %c0_10 = arith.constant 0 : index
    %22 = vector.load %arg4[%c0_8, %c0_9, %c0_10] : memref<1x1x256xf32, #tpu.memory_space<vmem>>, vector<1x1x256xf32>
    %23 = vector.shape_cast %22 : vector<1x1x256xf32> to vector<1x256xf32>
    %24 = vector.shape_cast %21 : vector<1x256xf32> to vector<1x1x256xf32>
    tpu.vector_store %arg4[%c0_8, %c0_9, %c0_10], %24 {strides = array<i32>} : memref<1x1x256xf32, #tpu.memory_space<vmem>>, vector<1x1x256xf32>,
    return
  }
  func.func @transform_0(%arg0: i32, %arg1: i32) -> (i32, i32, i32) {
    %c0_i32 = arith.constant 0 : i32
    %c0_i32_0 = arith.constant 0 : i32
    return %arg0, %c0_i32, %arg1 : i32, i32, i32
  }
  func.func @transform_1(%arg0: i32, %arg1: i32) -> (i32, i32, i32) {
    %c0_i32 = arith.constant 0 : i32
    %c0_i32_0 = arith.constant 0 : i32
    return %arg0, %c0_i32, %arg1 : i32, i32, i32
  }
  func.func @transform_2(%arg0: i32, %arg1: i32) -> (i32, i32, i32) {
    %c0_i32 = arith.constant 0 : i32
    %c0_i32_0 = arith.constant 0 : i32
    return %arg0, %c0_i32, %arg1 : i32, i32, i32
  }
}

</mosaic_0001>

<bundles_post_ra>
// kernel: tpu_custom_call.1
= control target key start
LH: loop header
LB: loop body
LE: loop exit
PB: predicated region body
PF: predicated region fallthrough
CT: control target
= control target key end

     0   :  { %7 = vsyncpa [#allocation3], 0  ;;  %s885_s0 = inlined_call_operand.hbm [shape: bf16[2,4,256], index: 0, kind: input, shape index: {}]   ;;  %s886_s1 = inlined_call_operand.hbm [shape: s32[2,1,256], index: 1, kind: input, shape index: {}]   ;;  %s887_s2 = inlined_call_operand.hbm [shape: f32[2,1,256], index: 2, kind: output, shape index: {}]  }
   0x1   :  { %9 = vsyncpa [#allocation3 + $0x1], 0 }
   0x2   :  { %10 = vsyncpa [#allocation6], 0 }
   0x3   :  { %12 = vsyncpa [#allocation6 + $0x1], 0 }
   0x4   :  { %13 = vsyncpa [#allocation4], 0 }
   0x5   :  { %15 = vsyncpa [#allocation4 + $0x1], 0  ;;  %s711_s9 = smov 0   ;;  %s713_s10 = smov 0  }
   0x6   :  { %s715_s11 = smov 0   ;;  %s717_s12 = smov 0  }
   0x7   :  { %s719_s13 = smov 0   ;;  %s721_s14 = smov 0  }
   0x8 LB: > { %s454_s15 = sadd.s32 4294967295, %s690_s14   ;;  %s455_s16 = sadd.s32 4294967294, %s690_s14   ;;  %s690_s14 = sphi %s721_s14, %s21_s14   ;;  %s686_s13 = sphi %s719_s13, %s899_s13   ;;  %s682_s12 = sphi %s717_s12, %s898_s12   ;;  %s678_s11 = sphi %s715_s11, %s897_s11   ;;  %s674_s10 = sphi %s713_s10, %s896_s10   ;;  %s670_s9 = sphi %s711_s9, %s895_s9  }
   0x9   : > { %s33_s17 = sadd.s32 1, %s686_s13  ;;  %s42_s18 = sadd.s32 1, %s678_s11 }
   0xa   : > { %p35_p0 = scmp.ge.s32.totalorder %s33_s17, 2  ;;  %p49_p1 = scmp.ne.s32.totalorder %s678_s11, %s674_s10 }
   0xb   : > { %p50_p2 = scmp.eq.s32.totalorder %s690_s14, 0  ;;  %p55_p3 = scmp.ne.s32.totalorder %s674_s10, %s670_s9 }
   0xc   : > { %s901_s17 = smov (%p35_p0, %s33_s17), 0  ;;  %p56_p5 = scmp.eq.s32.totalorder %s454_s15, 0 }
   0xd   : > { %p752_p4 = por %p50_p2, %p49_p1  ;;  %s37_s20 = ssub.s32 %s686_s13, %s901_s17 }
   0xe   : > { %p109_p6 = scmp.eq.s32.totalorder %s454_s15, 1  ;;  %p40_p7 = scmp.eq.s32.totalorder %s37_s20, 0 }
   0xf   : > { %p758_p8 = por %p56_p5, %p55_p3  ;;  %p115_p10 = scmp.eq.s32.totalorder %s455_s16, 1 }
  0x10   : > { %p762_p9 = por %p109_p6, %p49_p1  ;;  %p493_p13 = scmp.lt.s32.totalorder %s690_s14, 2 }
  0x11   : > { %s767_s23 = scalar_select %p40_p7, %s678_s11, %s42_s18  }
  0x12   : > { %p769_p11 = por %p115_p10, %p55_p3  ;;  %s776_s25 = sand.u32 1, %s678_s11  }
  0x13   : > { %s458_s26 = sshll.u32 %s776_s25, 2  ;;  %s473_s27 = sshll.u32 %s686_s13, 6 }
  0x14   : > { %s147_s30 = scalar_lea.hbm %s885_s0, %s473_s27  ;;  %s139_s3 = scalar_lea.vmem [#allocation2], %s458_s26 }
  0x15   : > { %s149_s4 = sshll.u32 %s139_s3, 4  ;;  %p785_p0 = pnand %p493_p13, %p752_p4  ;;  %s150_s4 = int_to_ptr.vmem [resolvable:$true] %s149_s4 }
  0x16   : > { %p464_p1 = scmp.ge.s32.totalorder %s690_s14, 1  ;;  %p175_p2 = scmp.lt.s32.totalorder %s690_s14, 3 }
  0x17   : > { %s136_s6 = scalar_lea.sflag [#allocation3], %s776_s25  ;;  %p552_p3 = pneg %p785_p0 }
  0x18   : > { %s563_s7 = scalar_lea.vmem %s150_s4, 64  ;;  %s692_s8 = smov [#allocation2]  }
  0x19   : > { %p564_p5 = scmp.ne.s32.totalorder %s150_s4, %s563_s7  ;;  %s568_s15 = sshll.u32 %s692_s8, 4  ;;  %s569_s15 = int_to_ptr.vmem [resolvable:$false] %s568_s15 }
  0x1a   : > { %s570_s16 = scalar_lea.vmem %s569_s15, 128  ;;  %p571_p4 = scmp.lt.s32.totalorder %s150_s4, %s569_s15 }
  0x1b   : > { %p566_p6 = pnand %p564_p5, %p552_p3  ;;  %p572_p10 = scmp.lt.s32.totalorder %s570_s16, %s563_s7 }
  0x1d   : > { %p567_p7 = pneg %p566_p6  ;;  %p573_p13 = por %p572_p10, %p571_p4 }
  0x1f   : > { %p574_p12 = pnand %p573_p13, %p567_p7 }
  0x21   : > { %577 = shalt.err (!%p574_p12)
}
  0x22   : > { %485 = dma.hbm_to_vmem [thread:$0]  (!%p785_p0), %s147_s30, 64, %s150_s4, %s136_s6  }
  0x23   : > { %p803_p5 = pnand %p464_p1, %p175_p2  ;;  %s461_s19 = sshll.u32 %s776_s25, 1 }
  0x24   : > { %s474_s20 = sshll.u32 %s686_s13, 5  ;;  %s160_s29 = scalar_lea.vmem [#allocation5], %s461_s19 }
  0x25   : > { %s168_s28 = scalar_lea.hbm %s886_s1, %s474_s20  ;;  %s170_s3 = sshll.u32 %s160_s29, 4  ;;  %s171_s3 = int_to_ptr.vmem [resolvable:$true] %s170_s3 }
  0x26   : > { %s157_s7 = scalar_lea.sflag [#allocation6], %s776_s25  ;;  %s591_s8 = scalar_lea.vmem %s171_s3, 32 }
  0x27   : > { %p592_p12 = scmp.ne.s32.totalorder %s171_s3, %s591_s8  ;;  %s693_s30 = smov [#allocation5]  }
  0x28   : > { %s596_s4 = sshll.u32 %s693_s30, 4  ;;  %s597_s4 = int_to_ptr.vmem [resolvable:$false] %s596_s4 }
  0x29   : > { %p594_p6 = pnand %p592_p12, %p552_p3  ;;  %s598_s6 = scalar_lea.vmem %s597_s4, 64 }
  0x2a   : > { %p599_p1 = scmp.lt.s32.totalorder %s171_s3, %s597_s4  ;;  %p600_p2 = scmp.lt.s32.totalorder %s598_s6, %s591_s8 }
  0x2b   : > { %p595_p7 = pneg %p594_p6 }
  0x2c   : > { %p601_p4 = por %p600_p2, %p599_p1 }
  0x2e   : > { %p602_p10 = pnand %p601_p4, %p595_p7 }
  0x30   : > { %605 = shalt.err (!%p602_p10)
}
  0x31   : > { %488 = dma.hbm_to_vmem [thread:$0]  (!%p785_p0), %s168_s28, 32, %s171_s3, %s157_s7  }
  0x32   : > { %179 = sbr.rel (%p803_p5) target bundleno = 151 (0x97), region = 28  ;;  %s821_s25 = sand.u32 (!%p803_p5), 1, %s674_s10  }
  0x33   : > { %s465_s15 = sshll.u32 (!%p803_p5), %s821_s25, 2  ;;  %s182_s16 = scalar_lea.sflag (!%p803_p5), [#allocation3], %s821_s25 }
  0x34   : > { %s185_s19 = scalar_lea.vmem (!%p803_p5), [#allocation2], %s465_s15 }
  0x37   : > { %657 = dma.done.wait (%p758_p8), %s182_s16, 64  }
  0x38   : > { %659 = vsyncadd (%p758_p8), %s182_s16, 4294967232  ;;  %s466_s5 = sshll.u32 %s821_s25, 1  ;;  %s191_s18 = scalar_lea.sflag [#allocation6], %s821_s25 }
  0x39   : > { %s194_s20 = scalar_lea.vmem [#allocation5], %s466_s5 }
  0x3a   : > { %661 = dma.done.wait (%p758_p8), %s191_s18, 32  }
  0x3b   : > { %663 = vsyncadd (%p758_p8), %s191_s18, 4294967264  ;;  %v223_v0 = vld [vmem:[%s185_s19] sm:$0xf]  ;;  %vm229_vm0 = vcmask 1043456   ;;  %v274_v19 = vlaneseq  ;;  %v225_v23 = vld [vmem:[%s194_s20] sm:$0x3] }
  0x3c   : > { %v224_v1 = vunpack.c.l.bf16 %v223_v0  ;;  %v694_v57 = vmov 1966171168   ;;  %s219_s21 = scalar_lea.vmem [#allocation7], %s466_s5  ;;  %s475_s27 = sshll.u32 %s682_s12, 5 }
  0x3d   : > { %v275_v21 = vshrl.u32 %v274_v19, 7  ;;  %v308_v58 = vunpack.c.l.s4 %v694_v57  ;;  %s344_s26 = sshll.u32 %s219_s21, 4  ;;  %vm324_vm3 = vcmp.lt.s32.totalorder %v274_v19, 256  ;;  %s342_s3 = scalar_lea.hbm %s887_s2, %s475_s27  ;;  %s345_s26 = int_to_ptr.vmem [resolvable:$true] %s344_s26 }
  0x3e   : > { %v227_v2 = vcombine.high %v224_v1, %v224_v1  ;;  %v230_v3 = vsel %vm229_vm0, %v224_v1, -inf  ;;  %s328_s7 = scalar_lea.sflag [#allocation4], %s821_s25  ;;  %s606_s8 = scalar_lea.vmem %s345_s26, 32 }
  0x3f   : > { %v231_v4 = vrot.slane %v230_v3, 4  ;;  %v278_v22 = vsub.s32 0, %v275_v21  ;;  %v282_v24 = vsub.s32 1, %v275_v21  ;;  %p607_p8 = scmp.ne.s32.totalorder %s345_s26, %s606_s8  ;;  %s695_s30 = smov [#allocation7]  }
  0x40   : > { %v237_v5 = vsel %vm229_vm0, %v227_v2, -inf  ;;  %s610_s4 = sshll.u32 %s695_s30, 4  ;;  %s611_s4 = int_to_ptr.vmem [resolvable:$false] %s610_s4 }
  0x41   : > { %v232_v6 = vmax.f32 %v230_v3, %v231_v4  ;;  %v238_v7 = vrot.slane %v237_v5, 4  ;;  %v279_v25 = vrot.slane %v225_v23, %v278_v22  ;;  %v283_v26 = vrot.slane %v225_v23, %v282_v24  ;;  %p608_p0 = pnand %p607_p8, %p762_p9  ;;  %s612_s6 = scalar_lea.vmem %s611_s4, 64 }
  0x42   : > { %p613_p13 = scmp.lt.s32.totalorder %s345_s26, %s611_s4  ;;  %p614_p5 = scmp.lt.s32.totalorder %s612_s6, %s606_s8 }
  0x43   : > { %v233_v8 = vrot.slane %v232_v6, 2  ;;  %v239_v9 = vmax.f32 %v237_v5, %v238_v7  ;;  %vm284_vm1 = vcmp.eq.s32.totalorder %v275_v21, %v279_v25  ;;  %vm285_vm2 = vcmp.eq.s32.totalorder %v275_v21, %v283_v26  ;;  %p609_p3 = pneg %p608_p0 }
  0x44   : > { %v286_v31 = vsel %vm284_vm1, %v224_v1, 0.0  ;;  %v287_v35 = vsel %vm285_vm2, %v227_v2, 0.0  ;;  %v309_v2 = vunpack.c.0.s8 %v308_v58  ;;  %p615_p12 = por %p614_p5, %p613_p13 }
  0x45   : > { %v234_v10 = vmax.f32 %v232_v6, %v233_v8  ;;  %v240_v11 = vrot.slane %v239_v9, 2  ;;  %v288_v36 = vsel %vm229_vm0, %v286_v31, 0.0  ;;  %v295_v39 = vsel %vm229_vm0, %v287_v35, 0.0 }
  0x46   : > { %v289_v42 = vrot.slane %v288_v36, 4  ;;  %v296_v45 = vrot.slane %v295_v39, 4  ;;  %v312_v6 = vsub.s32 %v309_v2, %v275_v21  ;;  %p616_p6 = pnand %p615_p12, %p609_p3 }
  0x47   : > { %v235_v12 = vrot.slane %v234_v10, 1  ;;  %v241_v13 = vmax.f32 %v239_v9, %v240_v11 }
  0x48   : > { %v290_v48 = vadd.f32 %v289_v42, %v288_v36  ;;  %v297_v50 = vadd.f32 %v296_v45, %v295_v39 }
  0x49   : > { %v236_v14 = vmax.f32 %v234_v10, %v235_v12  ;;  %v242_v15 = vrot.slane %v241_v13, 1 }
  0x4a   : > { %v291_v51 = vrot.slane %v290_v48, 2  ;;  %v298_v52 = vrot.slane %v297_v50, 2 }
  0x4b   : > { %v243_v16 = vmax.f32 %v241_v13, %v242_v15 }
  0x4c   : > { %v292_v53 = vadd.f32 %v291_v51, %v290_v48  ;;  %v299_v54 = vadd.f32 %v298_v52, %v297_v50 }
  0x4d   : > { %v246_v17 = vcombine.low %v236_v14, %v243_v16 }
  0x4e   : > { %v293_v55 = vrot.slane %v292_v53, 1  ;;  %v300_v56 = vrot.slane %v299_v54, 1 }
  0x4f   : > { %v248_v18 = vsub.f32 %v224_v1, %v246_v17 }
  0x50   : > { %v294_v61 = vadd.f32 %v293_v55, %v292_v53  ;;  %v301_v1 = vadd.f32 %v300_v56, %v299_v54 }
  0x51   : > { %v249_v20 = vmul.f32 1.442695, %v248_v18 }
  0x53   : > { %544 = vpow2.f32 %v249_v20 }
  0x60   : > { %v545_v27 = vpop.eup %544 }
  0x61   : > { %v252_v28 = vcombine.high %v545_v27, %v545_v27  ;;  %v254_v29 = vsel %vm229_vm0, %v545_v27, 0.0 }
  0x62   : > { %v255_v30 = vrot.slane %v254_v29, 4 }
  0x63   : > { %v261_v32 = vsel %vm229_vm0, %v252_v28, 0.0 }
  0x64   : > { %v256_v33 = vadd.f32 %v255_v30, %v254_v29  ;;  %v262_v34 = vrot.slane %v261_v32, 4 }
  0x66   : > { %v257_v37 = vrot.slane %v256_v33, 2  ;;  %v263_v38 = vadd.f32 %v262_v34, %v261_v32 }
  0x68   : > { %v258_v40 = vadd.f32 %v257_v37, %v256_v33  ;;  %v264_v41 = vrot.slane %v263_v38, 2 }
  0x6a   : > { %v259_v43 = vrot.slane %v258_v40, 1  ;;  %v265_v44 = vadd.f32 %v264_v41, %v263_v38 }
  0x6c   : > { %v260_v46 = vadd.f32 %v259_v43, %v258_v40  ;;  %v266_v47 = vrot.slane %v265_v44, 1 }
  0x6e   : > { %v267_v49 = vadd.f32 %v266_v47, %v265_v44  ;;  %546 = vlog2.f32 %v260_v46 }
  0x70   : > { %548 = vlog2.f32 %v267_v49 }
  0x7b   : > { %v547_v59 = vpop.eup %546 }
  0x7c   : > { %v269_v60 = vmul.f32 0.6931472, %v547_v59 }
  0x7d   : > { %v549_v62 = vpop.eup %548 }
  0x7e   : > { %v271_v63 = vmul.f32 0.6931472, %v549_v62  ;;  %v272_v0 = vadd.f32 %v269_v60, %v236_v14 }
  0x80   : > { %v273_v3 = vadd.f32 %v271_v63, %v243_v16  ;;  %v302_v4 = vsub.f32 %v272_v0, %v294_v61 }
  0x82   : > { %v303_v5 = vsub.f32 %v273_v3, %v301_v1 }
  0x84   : > { %v306_v7 = vcombine.low %v302_v4, %v303_v5 }
  0x86   : > { %v313_v8 = vrot.slane %v306_v7, %v312_v6 }
  0x88   : > { %v320_v9 = vrot.slane %v313_v8, %v312_v6 }
  0x8a   : > { %326 = vst.msk [vmem:[%s219_s21] sm:$0x3] %vm324_vm3, %v320_v9 }
  0x8b   : > { %619 = shalt.err (!%p616_p6)
}
  0x8c   : > { %s620_s12 = scalar_lea.hbm %s342_s3, 32  ;;  %s624_s16 = scalar_lea.hbm %s887_s2, 64 }
  0x8d   : > { %p621_p7 = scmp.ne.s32.totalorder %s342_s3, %s620_s12  ;;  %p625_p4 = scmp.lt.s32.totalorder %s342_s3, %s887_s2 }
  0x8e   : > { %p626_p10 = scmp.lt.s32.totalorder %s624_s16, %s620_s12 }
  0x8f   : > { %p622_p1 = pnand %p621_p7, %p762_p9 }
  0x90   : > { %p627_p8 = por %p626_p10, %p625_p4 }
  0x91   : > { %p623_p2 = pneg %p622_p1 }
  0x93   : > { %p628_p0 = pnand %p627_p8, %p623_p2 }
  0x95   : > { %631 = shalt.err (!%p628_p0)
}
  0x96   : > { %480 = dma.vmem_to_hbm [thread:$0]  (%p762_p9), %s345_s26, 32, %s342_s3, %s328_s7  }
  0x97 PF: > { %s356_s18 = sand.u32 1, %s670_s9   ;;  %p894_p3 = scmp.ge.s32.totalorder %s690_s14, 2 }
  0x98   : > { %s357_s20 = scalar_lea.sflag [#allocation4], %s356_s18 }
  0x99   : > { %p490_p13 = pnand %p894_p3, %p769_p11 }
  0x9b   : > { %p491_p5 = pneg %p490_p13 }
  0x9d   : > { %665 = dma.done.wait (%p491_p5), %s357_s20, 32  }
  0x9e   : > { %667 = vsyncadd (%p491_p5), %s357_s20, 4294967264  ;;  %s21_s14 = sadd.s32 1, %s690_s14   ;;  %s895_s9 = smov %s674_s10 }
  0x9f   : > { %p18_p12 = scmp.ge.s32.totalorder %s21_s14, 4   ;;  %s896_s10 = smov %s678_s11 }
  0xa0   : > { %s897_s11 = smov %s767_s23  ;;  %s898_s12 = smov %s686_s13 }
  0xa1   : > { %s899_s13 = smov %s901_s17  ;;  %20 = sbr.rel (!%p18_p12) target bundleno = 8 (0x8), region = 86 }
  0xa6   :  { %362 = vsyncpa [#allocation3], 1 }
  0xa7   :  { %364 = vsyncpa [#allocation3 + $0x1], 1 }
  0xa8   :  { %365 = vsyncpa [#allocation6], 1 }
  0xa9   :  { %367 = vsyncpa [#allocation6 + $0x1], 1 }
  0xaa   :  { %368 = vsyncpa [#allocation4], 1 }
  0xab   :  { %370 = vsyncpa [#allocation4 + $0x1], 1 }

</bundles_post_ra>
